<compile_context>
chip_gen: v6e
topology: v6e:2x2x1
jax: 0.10.0
libtpu: 0.0.40
codegen_flags: <defaults>
</compile_context>

<pallas_src>
import functools

import jax
import jax.numpy as jnp
from jax.experimental import pallas as pl
from jax.experimental.pallas import tpu as pltpu

SUBLANE_BF16 = 16  # bf16 sublane packing -> keep M tiles multiples of 16


def _round_up(n: int, m: int) -> int:
    return ((n + m - 1) // m) * m


def mlp_kernel(x_ref, w1_ref, b1_ref, w2_ref, b2_ref, w3_ref, b3_ref, o_ref):
    # Cast f32 activations -> bf16 on the VPU (nearly free, hidden under DMA/MXU).
    x = x_ref[...].astype(w1_ref.dtype)
    # fc1 + ReLU   (bf16 operands -> MXU, f32 accumulate; bias/ReLU on the VPU in f32)
    h = jnp.dot(x, w1_ref[...], preferred_element_type=jnp.float32)
    h = jnp.maximum(h + b1_ref[...], 0.0)
    # fc2 + ReLU
    h = jnp.dot(h.astype(w2_ref.dtype), w2_ref[...], preferred_element_type=jnp.float32)
    h = jnp.maximum(h + b2_ref[...], 0.0)
    # fc3 (no activation)
    h = jnp.dot(h.astype(w3_ref.dtype), w3_ref[...], preferred_element_type=jnp.float32)
    o_ref[...] = (h + b3_ref[...]).astype(o_ref.dtype)


def prepare_params(params, compute_dtype=jnp.bfloat16):
    """One-time prep: cast weights to the MXU compute dtype, keep biases f32.

    Weights are stored transposed vs. PyTorch ([in_features, out_features]) so the
    kernel computes y = x @ W + b directly on the MXU. No padding needed: all weight /
    bias blocks are full-extent, which is exempt from the (8,128) tiling rule.
    """
    return {
        "w1": params["w1"].astype(compute_dtype),
        "w2": params["w2"].astype(compute_dtype),
        "w3": params["w3"].astype(compute_dtype),
        "b1": params["b1"].astype(jnp.float32),
        "b2": params["b2"].astype(jnp.float32),
        "b3": params["b3"].astype(jnp.float32),
    }


def simple_model_forward(x, prepared, *, tm=None):
    """SimpleModel.forward as a single fused Pallas kernel.

    x: [B, input_dim] float32
    prepared: output of prepare_params (bf16 weights [in,out]-layout, f32 biases [1,out])
    tm: optional M tile (static); default auto-picks a tile giving >= 2 grid steps.
    """
    B, input_dim = x.shape
    hidden_dim = prepared["w1"].shape[1]
    output_dim = prepared["w3"].shape[1]

    if tm is None:
        # Aim for >= 2 grid steps so v7x's second TensorCore gets work, while keeping
        # tiles large enough to amortize per-grid-step overhead (cap 256).
        tm = min(256, _round_up(max(pl.cdiv(B, 2), SUBLANE_BF16), SUBLANE_BF16))
    else:
        tm = _round_up(min(tm, _round_up(B, SUBLANE_BF16)), SUBLANE_BF16)
    n_steps = pl.cdiv(B, tm)  # ragged last block handled by Pallas (masked stores)

    w1, w2, w3 = prepared["w1"], prepared["w2"], prepared["w3"]
    b1, b2, b3 = prepared["b1"], prepared["b2"], prepared["b3"]

    # Grid-invariant operands: constant block index + single buffer (no re-DMA, half
    # the weight VMEM residency).
    def const_spec(a):
        return pl.BlockSpec(a.shape, lambda i: (0, 0), pipeline_mode=pl.Buffered(1))

    flops = 2 * B * (input_dim * hidden_dim + hidden_dim * hidden_dim
                     + hidden_dim * output_dim)
    bytes_accessed = (
        x.size * x.dtype.itemsize
        + (w1.size + w2.size + w3.size) * w1.dtype.itemsize
        + (b1.size + b2.size + b3.size) * 4
        + B * output_dim * 4
    )

    return pl.pallas_call(
        mlp_kernel,
        out_shape=jax.ShapeDtypeStruct((B, output_dim), jnp.float32),
        grid_spec=pltpu.PrefetchScalarGridSpec(
            num_scalar_prefetch=0,
            grid=(n_steps,),
            in_specs=[
                pl.BlockSpec((tm, input_dim), lambda i: (i, 0)),  # activations: M-tiled
                const_spec(w1), const_spec(b1),
                const_spec(w2), const_spec(b2),
                const_spec(w3), const_spec(b3),
            ],
            out_specs=pl.BlockSpec((tm, output_dim), lambda i: (i, 0)),
        ),
        compiler_params=pltpu.CompilerParams(
            dimension_semantics=("parallel",),   # batch tiles shard across v7x TCs
            # Footprint today is < 1 MiB; 48 MiB fits v7x's 64 MiB physical VMEM.
            # On v5e/v6e (128 MiB) this could be raised to ~96 MiB if tiles grow.
            vmem_limit_bytes=48 * 1024 * 1024,
        ),
        cost_estimate=pl.CostEstimate(
            flops=flops, transcendentals=0, bytes_accessed=bytes_accessed),
    )(x, w1, b1, w2, b2, w3, b3)


def init_params(key, input_dim, hidden_dim, output_dim):
    # Mimics nn.Linear default init: U(-1/sqrt(fan_in), 1/sqrt(fan_in)).
    ks = jax.random.split(key, 6)

    def lin(kw, kb, fan_in, fan_out):
        bound = 1.0 / jnp.sqrt(fan_in)
        w = jax.random.uniform(kw, (fan_in, fan_out), jnp.float32, -bound, bound)
        b = jax.random.uniform(kb, (1, fan_out), jnp.float32, -bound, bound)
        return w, b

    w1, b1 = lin(ks[0], ks[1], input_dim, hidden_dim)
    w2, b2 = lin(ks[2], ks[3], hidden_dim, hidden_dim)
    w3, b3 = lin(ks[4], ks[5], hidden_dim, output_dim)
    return {"w1": w1, "b1": b1, "w2": w2, "b2": b2, "w3": w3, "b3": b3}


def reference_forward(x, p, compute_dtype=jnp.bfloat16):
    # Same mixed-precision recipe as the kernel: bf16 matmul operands, f32 accumulate,
    # f32 bias + ReLU.
    cd = compute_dtype
    h = jnp.dot(x.astype(cd), p["w1"].astype(cd), preferred_element_type=jnp.float32)
    h = jnp.maximum(h + p["b1"], 0.0)
    h = jnp.dot(h.astype(cd), p["w2"].astype(cd), preferred_element_type=jnp.float32)
    h = jnp.maximum(h + p["b2"], 0.0)
    h = jnp.dot(h.astype(cd), p["w3"].astype(cd), preferred_element_type=jnp.float32)
    return h + p["b3"]


if __name__ == "__main__":
    key = jax.random.PRNGKey(0)
    k_params, k_x1, k_x2 = jax.random.split(key, 3)

    input_dim, hidden_dim, output_dim = 32, 64, 16
    params = init_params(k_params, input_dim, hidden_dim, output_dim)
    prepared = prepare_params(params)            # one-time weight cast (hoisted)

    fwd = jax.jit(simple_model_forward, static_argnames=("tm",))

    # Case 1: tiny batch (single grid step; ragged M block -> masked stores).
    x1 = jax.random.normal(k_x1, (8, input_dim), jnp.float32)
    out1 = jax.block_until_ready(fwd(x1, prepared))
    ref1 = reference_forward(x1, params)
    assert out1.shape == (8, output_dim)
    assert jnp.allclose(out1, ref1, atol=2e-3, rtol=2e-3), float(jnp.max(jnp.abs(out1 - ref1)))

    # Case 2: batch not a multiple of the tile (auto tm -> 2 grid steps, ragged last
    # block, no batch padding, no trailing slice).
    x2 = jax.random.normal(k_x2, (200, input_dim), jnp.float32)
    out2 = jax.block_until_ready(fwd(x2, prepared))
    ref2 = reference_forward(x2, params)
    assert out2.shape == (200, output_dim)
    assert jnp.allclose(out2, ref2, atol=2e-3, rtol=2e-3), float(jnp.max(jnp.abs(out2 - ref2)))

    # Case 3: explicit small tile (exercises the user-supplied tm rounding path).
    out3 = jax.block_until_ready(fwd(x2, prepared, tm=64))
    assert out3.shape == (200, output_dim)
    assert jnp.allclose(out3, ref2, atol=2e-3, rtol=2e-3), float(jnp.max(jnp.abs(out3 - ref2)))

    print("KERNEL_OK")
</pallas_src>

<mosaic_0001>
module attributes {stable_mosaic.version = 11 : i64} {
  func.func @mlp_kernel(%arg0: i32, %arg1: memref<16x32xf32, #tpu.memory_space<vmem>>, %arg2: memref<32x64xbf16, #tpu.memory_space<vmem>>, %arg3: memref<1x64xf32, #tpu.memory_space<vmem>>, %arg4: memref<64x64xbf16, #tpu.memory_space<vmem>>, %arg5: memref<1x64xf32, #tpu.memory_space<vmem>>, %arg6: memref<64x16xbf16, #tpu.memory_space<vmem>>, %arg7: memref<1x16xf32, #tpu.memory_space<vmem>>, %arg8: memref<16x16xf32, #tpu.memory_space<vmem>>) attributes {dimension_semantics = [#tpu.dimension_semantics<parallel>], iteration_bounds = array<i64: 1>, scalar_prefetch = 0 : i64, scratch_operands = 0 : i64, tpu.core_type = #tpu.core_type<tc>, window_params = [{transform_indices = @transform_0, window_bounds = array<i64: 16, 32>}, {pipeline_mode = #tpu.pipeline_mode<synchronous>, transform_indices = @transform_1, window_bounds = array<i64: 32, 64>}, {pipeline_mode = #tpu.pipeline_mode<synchronous>, transform_indices = @transform_2, window_bounds = array<i64: 1, 64>}, {pipeline_mode = #tpu.pipeline_mode<synchronous>, transform_indices = @transform_3, window_bounds = array<i64: 64, 64>}, {pipeline_mode = #tpu.pipeline_mode<synchronous>, transform_indices = @transform_4, window_bounds = array<i64: 1, 64>}, {pipeline_mode = #tpu.pipeline_mode<synchronous>, transform_indices = @transform_5, window_bounds = array<i64: 64, 16>}, {pipeline_mode = #tpu.pipeline_mode<synchronous>, transform_indices = @transform_6, window_bounds = array<i64: 1, 16>}, {transform_indices = @transform_7, window_bounds = array<i64: 16, 16>}]} {
    %c0 = arith.constant 0 : index
    %c0_0 = arith.constant 0 : index
    %0 = vector.load %arg1[%c0, %c0_0] : memref<16x32xf32, #tpu.memory_space<vmem>>, vector<16x32xf32>
    %1 = arith.truncf %0 : vector<16x32xf32> to vector<16x32xbf16>
    %c0_1 = arith.constant 0 : index
    %c0_2 = arith.constant 0 : index
    %2 = vector.load %arg2[%c0_1, %c0_2] : memref<32x64xbf16, #tpu.memory_space<vmem>>, vector<32x64xbf16>
    %cst = arith.constant dense<0.000000e+00> : vector<16x64xf32>
    %3 = tpu.matmul %1, %2, %cst {dimension_numbers = #tpu.dot_dimension_numbers<[1], [0], [0], [1], [0, 0, 1, 1], [], []>} : vector<16x32xbf16>, vector<32x64xbf16>, vector<16x64xf32> -> vector<16x64xf32>
    %c0_3 = arith.constant 0 : index
    %c0_4 = arith.constant 0 : index
    %4 = vector.load %arg3[%c0_3, %c0_4] : memref<1x64xf32, #tpu.memory_space<vmem>>, vector<1x64xf32>
    %5 = vector.broadcast %4 : vector<1x64xf32> to vector<16x64xf32>
    %6 = arith.addf %3, %5 : vector<16x64xf32>
    %cst_5 = arith.constant 0.000000e+00 : f32
    %7 = vector.broadcast %cst_5 : f32 to vector<16x64xf32>
    %8 = arith.maximumf %6, %7 : vector<16x64xf32>
    %9 = arith.truncf %8 : vector<16x64xf32> to vector<16x64xbf16>
    %c0_6 = arith.constant 0 : index
    %c0_7 = arith.constant 0 : index
    %10 = vector.load %arg4[%c0_6, %c0_7] : memref<64x64xbf16, #tpu.memory_space<vmem>>, vector<64x64xbf16>
    %cst_8 = arith.constant dense<0.000000e+00> : vector<16x64xf32>
    %11 = tpu.matmul %9, %10, %cst_8 {dimension_numbers = #tpu.dot_dimension_numbers<[1], [0], [0], [1], [0, 0, 1, 1], [], []>} : vector<16x64xbf16>, vector<64x64xbf16>, vector<16x64xf32> -> vector<16x64xf32>
    %c0_9 = arith.constant 0 : index
    %c0_10 = arith.constant 0 : index
    %12 = vector.load %arg5[%c0_9, %c0_10] : memref<1x64xf32, #tpu.memory_space<vmem>>, vector<1x64xf32>
    %13 = vector.broadcast %12 : vector<1x64xf32> to vector<16x64xf32>
    %14 = arith.addf %11, %13 : vector<16x64xf32>
    %cst_11 = arith.constant 0.000000e+00 : f32
    %15 = vector.broadcast %cst_11 : f32 to vector<16x64xf32>
    %16 = arith.maximumf %14, %15 : vector<16x64xf32>
    %17 = arith.truncf %16 : vector<16x64xf32> to vector<16x64xbf16>
    %c0_12 = arith.constant 0 : index
    %c0_13 = arith.constant 0 : index
    %18 = vector.load %arg6[%c0_12, %c0_13] : memref<64x16xbf16, #tpu.memory_space<vmem>>, vector<64x16xbf16>
    %cst_14 = arith.constant dense<0.000000e+00> : vector<16x16xf32>
    %19 = tpu.matmul %17, %18, %cst_14 {dimension_numbers = #tpu.dot_dimension_numbers<[1], [0], [0], [1], [0, 0, 1, 1], [], []>} : vector<16x64xbf16>, vector<64x16xbf16>, vector<16x16xf32> -> vector<16x16xf32>
    %c0_15 = arith.constant 0 : index
    %c0_16 = arith.constant 0 : index
    %20 = vector.load %arg7[%c0_15, %c0_16] : memref<1x16xf32, #tpu.memory_space<vmem>>, vector<1x16xf32>
    %21 = vector.broadcast %20 : vector<1x16xf32> to vector<16x16xf32>
    %22 = arith.addf %19, %21 : vector<16x16xf32>
    %c0_17 = arith.constant 0 : index
    %c0_18 = arith.constant 0 : index
    %23 = vector.load %arg8[%c0_17, %c0_18] : memref<16x16xf32, #tpu.memory_space<vmem>>, vector<16x16xf32>
    tpu.vector_store %arg8[%c0_17, %c0_18], %22 {strides = array<i32>} : memref<16x16xf32, #tpu.memory_space<vmem>>, vector<16x16xf32>,
    return
  }
  func.func @transform_0(%arg0: i32) -> (i32, i32) {
    %c0_i32 = arith.constant 0 : i32
    %c0_i32_0 = arith.constant 0 : i32
    return %arg0, %c0_i32 : i32, i32
  }
  func.func @transform_1(%arg0: i32) -> (i32, i32) {
    %c0_i32 = arith.constant 0 : i32
    %c0_i32_0 = arith.constant 0 : i32
    %c0_i32_1 = arith.constant 0 : i32
    return %c0_i32, %c0_i32_0 : i32, i32
  }
  func.func @transform_2(%arg0: i32) -> (i32, i32) {
    %c0_i32 = arith.constant 0 : i32
    %c0_i32_0 = arith.constant 0 : i32
    %c0_i32_1 = arith.constant 0 : i32
    return %c0_i32, %c0_i32_0 : i32, i32
  }
  func.func @transform_3(%arg0: i32) -> (i32, i32) {
    %c0_i32 = arith.constant 0 : i32
    %c0_i32_0 = arith.constant 0 : i32
    %c0_i32_1 = arith.constant 0 : i32
    return %c0_i32, %c0_i32_0 : i32, i32
  }
  func.func @transform_4(%arg0: i32) -> (i32, i32) {
    %c0_i32 = arith.constant 0 : i32
    %c0_i32_0 = arith.constant 0 : i32
    %c0_i32_1 = arith.constant 0 : i32
    return %c0_i32, %c0_i32_0 : i32, i32
  }
  func.func @transform_5(%arg0: i32) -> (i32, i32) {
    %c0_i32 = arith.constant 0 : i32
    %c0_i32_0 = arith.constant 0 : i32
    %c0_i32_1 = arith.constant 0 : i32
    return %c0_i32, %c0_i32_0 : i32, i32
  }
  func.func @transform_6(%arg0: i32) -> (i32, i32) {
    %c0_i32 = arith.constant 0 : i32
    %c0_i32_0 = arith.constant 0 : i32
    %c0_i32_1 = arith.constant 0 : i32
    return %c0_i32, %c0_i32_0 : i32, i32
  }
  func.func @transform_7(%arg0: i32) -> (i32, i32) {
    %c0_i32 = arith.constant 0 : i32
    %c0_i32_0 = arith.constant 0 : i32
    return %arg0, %c0_i32 : i32, i32
  }
}

</mosaic_0001>

<bundles_post_ra>
// kernel: simple_model_forward.1
= control target key start
LH: loop header
LB: loop body
LE: loop exit
PB: predicated region body
PF: predicated region fallthrough
CT: control target
= control target key end

     0   :  { %12 = vsyncpa [#allocation3], 0  ;;  %s599_s0 = inlined_call_operand.hbm [shape: f32[8,32], index: 0, kind: input, shape index: {}]   ;;  %s600_s1 = inlined_call_operand.vmem [shape: bf16[32,64], index: 1, kind: input, shape index: {}]   ;;  %s601_s2 = inlined_call_operand.vmem [shape: f32[1,64], index: 2, kind: input, shape index: {}]   ;;  %s602_s3 = inlined_call_operand.vmem [shape: bf16[64,64], index: 3, kind: input, shape index: {}]   ;;  %s603_s4 = inlined_call_operand.hbm [shape: f32[1,64], index: 4, kind: input, shape index: {}]   ;;  %s604_s5 = inlined_call_operand.vmem [shape: bf16[64,16], index: 5, kind: input, shape index: {}]   ;;  %s605_s6 = inlined_call_operand.hbm [shape: f32[1,16], index: 6, kind: input, shape index: {}]   ;;  %s606_s7 = inlined_call_operand.hbm [shape: f32[8,16], index: 7, kind: output, shape index: {}]  }
   0x1   :  { %13 = vsyncpa [#allocation6], 0 }
   0x2   :  { %14 = vsyncpa [#allocation4], 0 }
   0x3   :  { %19 = vsyncadd [#allocation3], 128  ;;  %s495_s24 = smov [#allocation5]   ;;  %s496_s26 = smov [#allocation2]  }
   0x4   :  { %s39_s25 = sshll.u32 %s495_s24, 4  ;;  %s20_s27 = sshll.u32 %s496_s26, 4  ;;  %s40_s25 = int_to_ptr.vmem [resolvable:$true] %s39_s25  ;;  %s21_s27 = int_to_ptr.vmem [resolvable:$true] %s20_s27 }
   0x5   :  { %s417_s28 = scalar_lea.vmem %s40_s25, 16  ;;  %s421_s29 = scalar_lea.vmem %s40_s25, 32 }
   0x6   :  { %p418_p0 = scmp.ne.s32.totalorder %s40_s25, %s417_s28  ;;  %p422_p1 = scmp.lt.s32.totalorder %s40_s25, %s40_s25 }
   0x7   :  { %p423_p2 = scmp.lt.s32.totalorder %s421_s29, %s417_s28 }
   0x9   :  { %p424_p3 = por %p423_p2, %p422_p1 }
   0xb   :  { %p425_p4 = pnand %p424_p3, %p418_p0 }
   0xd   :  { %428 = shalt.err (!%p425_p4)
}
   0xe   :  { %42 = dma.hbm_to_vmem [thread:$0]  %s603_s4, 16, %s40_s25, [#allocation6]  }
   0xf   :  { %s437_s9 = scalar_lea.vmem %s21_s27, 128  ;;  %s441_s10 = scalar_lea.vmem %s21_s27, 256 }
  0x10   :  { %p438_p5 = scmp.ne.s32.totalorder %s21_s27, %s437_s9  ;;  %p442_p6 = scmp.lt.s32.totalorder %s21_s27, %s21_s27 }
  0x11   :  { %p443_p7 = scmp.lt.s32.totalorder %s441_s10, %s437_s9 }
  0x13   :  { %p444_p8 = por %p443_p7, %p442_p6 }
  0x15   :  { %p445_p9 = pnand %p444_p8, %p438_p5 }
  0x17   :  { %448 = shalt.err (!%p445_p9)
}
  0x18   :  { %s497_s11 = smov 128   ;;  %s498_s12 = smov 8  }
  0x19   :  { %26 = dma.hbm_to_vmem [thread:$0]  %s599_s0, 128, %s21_s27, [#allocation3], %s497_s11, %s497_s11, %s498_s12  }
  0x1a   :  { %s499_s15 = smov [#allocation7]  }
  0x1b   :  { %s51_s16 = sshll.u32 %s499_s15, 4  ;;  %s52_s16 = int_to_ptr.vmem [resolvable:$true] %s51_s16 }
  0x1c   :  { %s457_s4 = scalar_lea.vmem %s52_s16, 16  ;;  %s461_s17 = scalar_lea.vmem %s52_s16, 32 }
  0x1d   :  { %p458_p10 = scmp.ne.s32.totalorder %s52_s16, %s457_s4  ;;  %p462_p11 = scmp.lt.s32.totalorder %s52_s16, %s52_s16 }
  0x1e   :  { %p463_p12 = scmp.lt.s32.totalorder %s461_s17, %s457_s4 }
  0x20   :  { %p464_p13 = por %p463_p12, %p462_p11 }
  0x22   :  { %p465_p0 = pnand %p464_p13, %p458_p10 }
  0x24   :  { %468 = shalt.err (!%p465_p0)
}
  0x25   :  { %54 = dma.hbm_to_vmem [thread:$0]  %s605_s6, 16, %s52_s16, [#allocation6]  }
  0x26   :  { %489 = dma.done.wait [#allocation3], 256  }
  0x27   :  { %490 = vsyncadd [#allocation3], 4294967040 }
  0x28   :  { %491 = dma.done.wait [#allocation6], 32  }
  0x29   :  { %492 = vsyncadd [#allocation6], 4294967264  ;;  %v500_v0 = vmov 0.0   ;;  %vm501_vm0 = vmmov 0   ;;  %v399_v1 = vld [vmem:[%s600_s1 + $0x8] sm:$0xff]   ;;  %v400_v2 = vld [vmem:[%s600_s1] sm:$0xff]  }
  0x2a   :  { %359 = vmatprep.subr.bf16.mxu0 %v500_v0  ;;  %363 = vmatprep.mubr.msk.bf16.mxu0 %vm501_vm0, %v500_v0  ;;  %v65_v3 = vld [vmem:[#allocation2] sm:$0xff]  ;;  %v66_v4 = vld [vmem:[#allocation2 + $0x8] sm:$0xff]  ;;  %vm91_vm1 = vcmask 261120   ;;  %v401_v5 = vld [vmem:[%s602_s3 + $0x18] sm:$0xff]   ;;  %vm178_vm2 = vcmask 523264   ;;  %vm309_vm3 = vcmask 130048  }
  0x2b   :  { %367 = vmatprep.subr.bf16.mxu1 %v500_v0  ;;  %375 = vmatprep.mubr.msk.bf16.mxu1 %vm501_vm0, %v500_v0  ;;  %v67_v6 = vpack.c.bf16 %v66_v4, %v65_v3  ;;  %v402_v7 = vld [vmem:[%s602_s3 + $0x10] sm:$0xff]   ;;  %v403_v8 = vld [vmem:[%s602_s3 + $0x8] sm:$0xff]   ;;  %v404_v9 = vld [vmem:[%s602_s3] sm:$0xff]  }
  0x2c   :  { %360 = vmatpush3.bf16.msra.mxu0 %v399_v1  ;;  %368 = vmatpush3.bf16.msra.mxu1 %v401_v5  ;;  %v405_v10 = vld [vmem:[%s604_s5 + $0x18] sm:$0xff]   ;;  %v330_v11 = vld [vmem:[%s601_s2] ss:$0 sm:$0xff]  ;;  %v406_v21 = vld [vmem:[%s604_s5 + $0x10] sm:$0xff]  }
  0x2d   :  { %361 = vmatprep.subr.bf16.mxu0 %v500_v0  ;;  %369 = vmatprep.subr.bf16.mxu1 %v500_v0  ;;  %v407_v22 = vld [vmem:[%s604_s5 + $0x8] sm:$0xff]   ;;  %v408_v23 = vld [vmem:[%s604_s5] sm:$0xff]   ;;  %v334_v24 = vld [vmem:[#allocation5] ss:$0 sm:$0xff] }
  0x2e   :  { %v340_v34 = vld [vmem:[#allocation7] ss:$0 sm:$0xff] }
  0x30   :  { %362 = vmatpush3.bf16.msra.mxu0 %v400_v2  ;;  %370 = vmatpush3.bf16.msra.mxu1 %v402_v7 }
  0x31   :  { %379 = vmatprep.subr.bf16.mxu0 %v500_v0  ;;  %371 = vmatprep.subr.bf16.mxu1 %v500_v0 }
  0x33   :  { %364 = vmatmul.mubr.msk.bf16.vlgmr.msra.gmra.mxu0 %vm91_vm1, %v67_v6 }
  0x34   :  { %387 = vmatprep.mubr.msk.bf16.mxu0 %vm501_vm0, %v500_v0  ;;  %372 = vmatpush3.bf16.msra.mxu1 %v403_v8 }
  0x35   :  { %373 = vmatprep.subr.bf16.mxu1 %v500_v0  ;;  %380 = vmatpush3.bf16.msra.mxu0 %v405_v10 }
  0x36   :  { %381 = vmatprep.subr.bf16.mxu0 %v500_v0 }
  0x38   :  { %374 = vmatpush3.bf16.msra.mxu1 %v404_v9 }
  0x39   :  { %382 = vmatpush3.bf16.msra.mxu0 %v406_v21 }
  0x3a   :  { %383 = vmatprep.subr.bf16.mxu0 %v500_v0 }
  0x3d   :  { %384 = vmatpush3.bf16.msra.mxu0 %v407_v22 }
  0x3e   :  { %385 = vmatprep.subr.bf16.mxu0 %v500_v0 }
  0x41   :  { %386 = vmatpush3.bf16.msra.mxu0 %v408_v23 }
  0xf3   :  { %v129_v12 = vpop.f32.mrf.mxu0 }
  0xf4   :  { %v130_v14 = vadd.f32 %v330_v11, %v129_v12 }
  0xf5   :  { %v365_v13 = vpop.f32.mrf.mxu0 }
  0xf6   :  { %v136_v18 = vmax.f32 %v130_v14, 0.0 }
  0xf7   :  { %v132_v15 = vpop.f32.mrf.mxu0 }
  0xf8   :  { %v133_v16 = vadd.f32 %v330_v11, %v132_v15 }
  0xf9   :  { %v366_v17 = vpop.f32.mrf.mxu0 }
  0xfa   :  { %v137_v19 = vmax.f32 %v133_v16, 0.0 }
  0xfc   :  { %v138_v20 = vpack.c.bf16 %v137_v19, %v136_v18 }
  0xfe   :  { %376 = vmatmul.mubr.msk.bf16.vlgmr.msra.gmra.mxu1 %vm178_vm2, %v138_v20 }
 0x1be   :  { %v216_v25 = vpop.f32.mrf.mxu1 }
 0x1bf   :  { %v217_v27 = vadd.f32 %v334_v24, %v216_v25 }
 0x1c0   :  { %v377_v26 = vpop.f32.mrf.mxu1 }
 0x1c1   :  { %v223_v31 = vmax.f32 %v217_v27, 0.0 }
 0x1c2   :  { %v219_v28 = vpop.f32.mrf.mxu1 }
 0x1c3   :  { %v220_v29 = vadd.f32 %v334_v24, %v219_v28 }
 0x1c4   :  { %v378_v30 = vpop.f32.mrf.mxu1 }
 0x1c5   :  { %v224_v32 = vmax.f32 %v220_v29, 0.0 }
 0x1c7   :  { %v225_v33 = vpack.c.bf16 %v224_v32, %v223_v31 }
 0x1c9   :  { %388 = vmatmul.mubr.msk.bf16.vlgmr.msra.gmra.mxu0 %vm178_vm2, %v225_v33 }
 0x289   :  { %v302_v35 = vpop.f32.mrf.mxu0 }
 0x28a   :  { %v303_v36 = vadd.f32 %v340_v34, %v302_v35 }
 0x28b   :  { %v389_v37 = vpop.f32.mrf.mxu0 }
 0x28c   :  { %310 = vst.msk [vmem:[#allocation8] sm:$0xff] %vm309_vm3, %v303_v36 }
 0x28d   :  { %v305_v38 = vpop.f32.mrf.mxu0 }
 0x28e   :  { %v306_v39 = vadd.f32 %v340_v34, %v305_v38 }
 0x28f   :  { %v390_v40 = vpop.f32.mrf.mxu0 }
 0x290   :  { %311 = vst.msk [vmem:[#allocation8 + $0x8] sm:$0xff] %vm309_vm3, %v306_v39 }
 0x291   :  { %316 = vsyncadd [#allocation4], 128  ;;  %s502_s5 = smov [#allocation8]  }
 0x292   :  { %s317_s16 = sshll.u32 %s502_s5, 4  ;;  %s318_s16 = int_to_ptr.vmem [resolvable:$true] %s317_s16 }
 0x293   :  { %s469_s4 = scalar_lea.vmem %s318_s16, 128  ;;  %s473_s17 = scalar_lea.vmem %s318_s16, 256 }
 0x294   :  { %p470_p1 = scmp.ne.s32.totalorder %s318_s16, %s469_s4  ;;  %p474_p2 = scmp.lt.s32.totalorder %s318_s16, %s318_s16 }
 0x295   :  { %p475_p3 = scmp.lt.s32.totalorder %s473_s17, %s469_s4 }
 0x297   :  { %p476_p4 = por %p475_p3, %p474_p2 }
 0x299   :  { %p477_p5 = pnand %p476_p4, %p470_p1 }
 0x29b   :  { %480 = shalt.err (!%p477_p5)
}
 0x29c   :  { %323 = dma.vmem_to_hbm [thread:$0]  %s318_s16, 128, %s606_s7, [#allocation4], %s497_s11, %s497_s11, %s498_s12  }
 0x29d   :  { %493 = dma.done.wait [#allocation4], 256  }
 0x29e   :  { %494 = vsyncadd [#allocation4], 4294967040 }
 0x29f   :  { %327 = vsyncpa [#allocation3], 1 }
 0x2a0   :  { %328 = vsyncpa [#allocation6], 1 }
 0x2a1   :  { %329 = vsyncpa [#allocation4], 1 }

</bundles_post_ra>
